<compile_context>
chip_gen: v6e
topology: v6e:2x2x1
jax: 0.10.0
libtpu: 0.0.40
codegen_flags: <defaults>
</compile_context>

<pallas_src>
import jax
import jax.numpy as jnp
from jax.experimental import pallas as pl
from jax.experimental.pallas import tpu as pltpu

BN_EPS = 1e-5


def _ru(v, m):
    return -(-v // m) * m


def _mlp_kernel(x_ref,
                w1_ref, b1_ref, w2_ref, b2_ref, w3_ref, b3_ref,
                w4_ref, b4_ref,
                o_ref):
    """One batch tile: 3x (bf16 matmul -> f32 bias add -> bf16 ReLU) + lane-dense head row."""
    h = jnp.dot(x_ref[...], w1_ref[...], preferred_element_type=jnp.float32) + b1_ref[...]
    h = jnp.maximum(h.astype(jnp.bfloat16), 0)
    h = jnp.dot(h, w2_ref[...], preferred_element_type=jnp.float32) + b2_ref[...]
    h = jnp.maximum(h.astype(jnp.bfloat16), 0)
    h = jnp.dot(h, w3_ref[...], preferred_element_type=jnp.float32) + b3_ref[...]
    h = jnp.maximum(h.astype(jnp.bfloat16), 0)
    # Head Linear(64, 1): contract h's feature dim against the (1, 64) weight row so the
    # result is a lane-dense (1, tb) row (no (tb, 1) masked partial stores).
    row = jax.lax.dot_general(w4_ref[...], h, (((1,), (1,)), ((), ())),
                              preferred_element_type=jnp.float32)
    o_ref[...] = row + b4_ref[...]


def _fold_bn(params):
    """Fold eval-mode BatchNorm1d into the preceding Linear (per output column)."""
    folded = {}
    for i in (1, 2, 3):
        scale = params[f"g{i}"] * jax.lax.rsqrt(params[f"v{i}"] + BN_EPS)   # (1, F)
        shift = params[f"be{i}"] - params[f"m{i}"] * scale                  # (1, F)
        folded[f"w{i}"] = params[f"w{i}"] * scale                           # (in, F)*(1, F)
        folded[f"b{i}"] = params[f"b{i}"] * scale + shift                   # (1, F)
    folded["w4"] = params["w4"].reshape(1, -1)   # (1, 64) row for the head contraction
    folded["b4"] = params["b4"]                  # (1, 1)
    return folded


def prepare_params(params):
    """Fold BN and cast matmul weights to bf16 ONCE, outside the per-call hot path.
    Biases stay f32 (bias-add is done in f32 inside the kernel)."""
    f = _fold_bn(params)
    return (f["w1"].astype(jnp.bfloat16), f["b1"].astype(jnp.float32),
            f["w2"].astype(jnp.bfloat16), f["b2"].astype(jnp.float32),
            f["w3"].astype(jnp.bfloat16), f["b3"].astype(jnp.float32),
            f["w4"].astype(jnp.bfloat16), f["b4"].astype(jnp.float32))


def _vmem_capacity_bytes():
    try:
        cap = getattr(pltpu.get_tpu_info(), "vmem_capacity_bytes", None)
        if cap:
            return int(cap)
    except Exception:
        pass
    return 64 << 20  # conservative fallback = v7x per-TensorCore VMEM


def _choose_tb(batch, input_size, vmem_cap):
    """Batch tile: multiple of 128 (lane-dense out block), >=4 grid steps when B allows,
    bigger cap on 128-MiB chips, and double-buffered bf16 x tile within ~1/4 of VMEM."""
    in_lanes = _ru(max(input_size, 1), 128)
    cap = 2048 if vmem_cap >= (96 << 20) else 1024        # v5e/v6e vs v7x
    mem_cap = ((vmem_cap // 4) // (4 * in_lanes)) // 128 * 128
    cap = max(128, min(cap, mem_cap)) if mem_cap >= 128 else 128
    want = _ru(pl.cdiv(batch, 4), 128)                    # aim for >=4 grid steps
    return max(128, min(cap, want))


def co2_predictor_forward(x, weights):
    """x: (B, input_size) float. weights: tuple from prepare_params()."""
    B, input_size = x.shape
    vmem_cap = _vmem_capacity_bytes()
    tb = _choose_tb(B, input_size, vmem_cap)
    b_pad = _ru(B, tb)

    xb = x.astype(jnp.bfloat16)              # halve the dominant HBM input stream
    if b_pad != B:
        xb = jnp.pad(xb, ((0, b_pad - B), (0, 0)))

    def const_spec(a):
        # Full-array block with a constant index_map -> stays VMEM-resident across the grid.
        return pl.BlockSpec(a.shape, lambda i: (0, 0))

    def padded2d_bytes(shape, itemsize):
        sub = 16 if itemsize == 2 else 8
        return _ru(shape[0], sub) * _ru(shape[1], 128) * itemsize

    # VMEM accounting on lane-padded shapes: x/out double-buffered, weights counted x2
    # (no reliance on single-buffering), live intermediates, plus headroom; capped at
    # 3/4 of physical VMEM (v7x only has 64 MiB).
    w_bytes = sum(2 * padded2d_bytes(a.shape, a.dtype.itemsize) for a in weights)
    x_bytes = 2 * padded2d_bytes((tb, input_size), 2)
    o_bytes = 2 * padded2d_bytes((1, tb), 4)
    act_bytes = tb * (256 + 256 + 128 + 128) * 4
    vmem_limit = min((int(vmem_cap) * 3) // 4,
                     max(32 << 20, w_bytes + x_bytes + o_bytes + act_bytes + (8 << 20)))

    flops = 2 * b_pad * (input_size * 256 + 256 * 128 + 128 * 64 + 64)
    bytes_accessed = b_pad * input_size * 2 + b_pad * 4 + sum(
        int(a.size) * a.dtype.itemsize for a in weights)

    out = pl.pallas_call(
        _mlp_kernel,
        out_shape=jax.ShapeDtypeStruct((1, b_pad), jnp.float32),
        grid_spec=pltpu.PrefetchScalarGridSpec(
            num_scalar_prefetch=0,
            grid=(b_pad // tb,),
            in_specs=[pl.BlockSpec((tb, input_size), lambda i: (i, 0))]
                     + [const_spec(a) for a in weights],
            out_specs=pl.BlockSpec((1, tb), lambda i: (0, i)),
        ),
        compiler_params=pltpu.CompilerParams(
            dimension_semantics=("parallel",),
            vmem_limit_bytes=int(vmem_limit),
        ),
        cost_estimate=pl.CostEstimate(
            flops=int(flops), transcendentals=0, bytes_accessed=int(bytes_accessed)),
    )(xb, *weights)

    return out.reshape(-1)[:B].reshape(B, 1)


def init_params(key, input_size):
    """Deterministic init mirroring the PyTorch module's __init__:
       - Linear weights: xavier_normal_, biases: 0
       - BatchNorm1d: gamma=1, beta=0, running_mean=0, running_var=1
       Weights are stored as (in_features, out_features)."""
    dims = [(input_size, 256), (256, 128), (128, 64), (64, 1)]
    keys = jax.random.split(key, len(dims))
    p = {}
    for i, ((fin, fout), k) in enumerate(zip(dims, keys), start=1):
        std = (2.0 / (fin + fout)) ** 0.5  # xavier_normal_
        p[f"w{i}"] = (std * jax.random.normal(k, (fin, fout))).astype(jnp.float32)
        p[f"b{i}"] = jnp.zeros((1, fout), jnp.float32)
    for i, fout in enumerate([256, 128, 64], start=1):
        p[f"g{i}"] = jnp.ones((1, fout), jnp.float32)    # gamma
        p[f"be{i}"] = jnp.zeros((1, fout), jnp.float32)  # beta
        p[f"m{i}"] = jnp.zeros((1, fout), jnp.float32)   # running_mean
        p[f"v{i}"] = jnp.ones((1, fout), jnp.float32)    # running_var
    return p


if __name__ == "__main__":
    key = jax.random.PRNGKey(0)
    k_x, k_p = jax.random.split(key)

    INPUT_SIZE = 32
    BATCH = 8

    x = jax.random.normal(k_x, (BATCH, INPUT_SIZE), dtype=jnp.float32)
    params = init_params(k_p, INPUT_SIZE)

    weights = prepare_params(params)          # BN fold + bf16 cast, once (outside hot path)
    fwd = jax.jit(co2_predictor_forward)

    out = jax.block_until_ready(fwd(x, weights))

    # Pure-JAX f32 reference with UNfolded BN (validates folding too).  bf16 matmul
    # operands in the kernel loosen bitwise agreement, so the tolerance is widened.
    def ref(x, p):
        h = x
        for i in range(1, 4):
            h = h @ p[f"w{i}"] + p[f"b{i}"]
            scale = p[f"g{i}"] * jax.lax.rsqrt(p[f"v{i}"] + BN_EPS)
            h = jnp.maximum(h * scale + (p[f"be{i}"] - p[f"m{i}"] * scale), 0.0)
        return h @ p["w4"] + p["b4"]

    expected = ref(x, params)
    assert out.shape == (BATCH, 1), out.shape
    assert jnp.allclose(out, expected, atol=3e-2, rtol=3e-2), "mismatch vs reference"

    print("KERNEL_OK")
</pallas_src>

<mosaic_0001>
module attributes {stable_mosaic.version = 11 : i64} {
  func.func @_mlp_kernel(%arg0: i32, %arg1: memref<128x32xbf16, #tpu.memory_space<vmem>>, %arg2: memref<32x256xbf16, #tpu.memory_space<vmem>>, %arg3: memref<1x256xf32, #tpu.memory_space<vmem>>, %arg4: memref<256x128xbf16, #tpu.memory_space<vmem>>, %arg5: memref<1x128xf32, #tpu.memory_space<vmem>>, %arg6: memref<128x64xbf16, #tpu.memory_space<vmem>>, %arg7: memref<1x64xf32, #tpu.memory_space<vmem>>, %arg8: memref<1x64xbf16, #tpu.memory_space<vmem>>, %arg9: memref<1x1xf32, #tpu.memory_space<vmem>>, %arg10: memref<1x128xf32, #tpu.memory_space<vmem>>) attributes {dimension_semantics = [#tpu.dimension_semantics<parallel>], iteration_bounds = array<i64: 1>, scalar_prefetch = 0 : i64, scratch_operands = 0 : i64, tpu.core_type = #tpu.core_type<tc>, window_params = [{transform_indices = @transform_0, window_bounds = array<i64: 128, 32>}, {pipeline_mode = #tpu.pipeline_mode<synchronous>, transform_indices = @transform_1, window_bounds = array<i64: 32, 256>}, {pipeline_mode = #tpu.pipeline_mode<synchronous>, transform_indices = @transform_2, window_bounds = array<i64: 1, 256>}, {pipeline_mode = #tpu.pipeline_mode<synchronous>, transform_indices = @transform_3, window_bounds = array<i64: 256, 128>}, {pipeline_mode = #tpu.pipeline_mode<synchronous>, transform_indices = @transform_4, window_bounds = array<i64: 1, 128>}, {pipeline_mode = #tpu.pipeline_mode<synchronous>, transform_indices = @transform_5, window_bounds = array<i64: 128, 64>}, {pipeline_mode = #tpu.pipeline_mode<synchronous>, transform_indices = @transform_6, window_bounds = array<i64: 1, 64>}, {pipeline_mode = #tpu.pipeline_mode<synchronous>, transform_indices = @transform_7, window_bounds = array<i64: 1, 64>}, {pipeline_mode = #tpu.pipeline_mode<synchronous>, transform_indices = @transform_8, window_bounds = array<i64: 1, 1>}, {transform_indices = @transform_9, window_bounds = array<i64: 1, 128>}]} {
    %c0 = arith.constant 0 : index
    %c0_0 = arith.constant 0 : index
    %0 = vector.load %arg1[%c0, %c0_0] : memref<128x32xbf16, #tpu.memory_space<vmem>>, vector<128x32xbf16>
    %c0_1 = arith.constant 0 : index
    %c0_2 = arith.constant 0 : index
    %1 = vector.load %arg2[%c0_1, %c0_2] : memref<32x256xbf16, #tpu.memory_space<vmem>>, vector<32x256xbf16>
    %cst = arith.constant dense<0.000000e+00> : vector<128x256xf32>
    %2 = tpu.matmul %0, %1, %cst {dimension_numbers = #tpu.dot_dimension_numbers<[1], [0], [0], [1], [0, 0, 1, 1], [], []>} : vector<128x32xbf16>, vector<32x256xbf16>, vector<128x256xf32> -> vector<128x256xf32>
    %c0_3 = arith.constant 0 : index
    %c0_4 = arith.constant 0 : index
    %3 = vector.load %arg3[%c0_3, %c0_4] : memref<1x256xf32, #tpu.memory_space<vmem>>, vector<1x256xf32>
    %4 = vector.broadcast %3 : vector<1x256xf32> to vector<128x256xf32>
    %5 = arith.addf %2, %4 : vector<128x256xf32>
    %6 = arith.truncf %5 : vector<128x256xf32> to vector<128x256xbf16>
    %cst_5 = arith.constant 0.000000e+00 : bf16
    %7 = vector.broadcast %cst_5 : bf16 to vector<128x256xbf16>
    %8 = arith.maximumf %6, %7 : vector<128x256xbf16>
    %c0_6 = arith.constant 0 : index
    %c0_7 = arith.constant 0 : index
    %9 = vector.load %arg4[%c0_6, %c0_7] : memref<256x128xbf16, #tpu.memory_space<vmem>>, vector<256x128xbf16>
    %cst_8 = arith.constant dense<0.000000e+00> : vector<128x128xf32>
    %10 = tpu.matmul %8, %9, %cst_8 {dimension_numbers = #tpu.dot_dimension_numbers<[1], [0], [0], [1], [0, 0, 1, 1], [], []>} : vector<128x256xbf16>, vector<256x128xbf16>, vector<128x128xf32> -> vector<128x128xf32>
    %c0_9 = arith.constant 0 : index
    %c0_10 = arith.constant 0 : index
    %11 = vector.load %arg5[%c0_9, %c0_10] : memref<1x128xf32, #tpu.memory_space<vmem>>, vector<1x128xf32>
    %12 = vector.broadcast %11 : vector<1x128xf32> to vector<128x128xf32>
    %13 = arith.addf %10, %12 : vector<128x128xf32>
    %14 = arith.truncf %13 : vector<128x128xf32> to vector<128x128xbf16>
    %cst_11 = arith.constant 0.000000e+00 : bf16
    %15 = vector.broadcast %cst_11 : bf16 to vector<128x128xbf16>
    %16 = arith.maximumf %14, %15 : vector<128x128xbf16>
    %c0_12 = arith.constant 0 : index
    %c0_13 = arith.constant 0 : index
    %17 = vector.load %arg6[%c0_12, %c0_13] : memref<128x64xbf16, #tpu.memory_space<vmem>>, vector<128x64xbf16>
    %cst_14 = arith.constant dense<0.000000e+00> : vector<128x64xf32>
    %18 = tpu.matmul %16, %17, %cst_14 {dimension_numbers = #tpu.dot_dimension_numbers<[1], [0], [0], [1], [0, 0, 1, 1], [], []>} : vector<128x128xbf16>, vector<128x64xbf16>, vector<128x64xf32> -> vector<128x64xf32>
    %c0_15 = arith.constant 0 : index
    %c0_16 = arith.constant 0 : index
    %19 = vector.load %arg7[%c0_15, %c0_16] : memref<1x64xf32, #tpu.memory_space<vmem>>, vector<1x64xf32>
    %20 = vector.broadcast %19 : vector<1x64xf32> to vector<128x64xf32>
    %21 = arith.addf %18, %20 : vector<128x64xf32>
    %22 = arith.truncf %21 : vector<128x64xf32> to vector<128x64xbf16>
    %cst_17 = arith.constant 0.000000e+00 : bf16
    %23 = vector.broadcast %cst_17 : bf16 to vector<128x64xbf16>
    %24 = arith.maximumf %22, %23 : vector<128x64xbf16>
    %c0_18 = arith.constant 0 : index
    %c0_19 = arith.constant 0 : index
    %25 = vector.load %arg8[%c0_18, %c0_19] : memref<1x64xbf16, #tpu.memory_space<vmem>>, vector<1x64xbf16>
    %cst_20 = arith.constant dense<0.000000e+00> : vector<1x128xf32>
    %26 = tpu.matmul %25, %24, %cst_20 {dimension_numbers = #tpu.dot_dimension_numbers<[1], [1], [0], [0], [0, 0, 1, 0], [], []>} : vector<1x64xbf16>, vector<128x64xbf16>, vector<1x128xf32> -> vector<1x128xf32>
    %c0_21 = arith.constant 0 : index
    %c0_22 = arith.constant 0 : index
    %27 = vector.load %arg9[%c0_21, %c0_22] : memref<1x1xf32, #tpu.memory_space<vmem>>, vector<1x1xf32>
    %28 = vector.broadcast %27 : vector<1x1xf32> to vector<1x128xf32>
    %29 = arith.addf %26, %28 : vector<1x128xf32>
    %c0_23 = arith.constant 0 : index
    %c0_24 = arith.constant 0 : index
    %30 = vector.load %arg10[%c0_23, %c0_24] : memref<1x128xf32, #tpu.memory_space<vmem>>, vector<1x128xf32>
    tpu.vector_store %arg10[%c0_23, %c0_24], %29 {strides = array<i32>} : memref<1x128xf32, #tpu.memory_space<vmem>>, vector<1x128xf32>,
    return
  }
  func.func @transform_0(%arg0: i32) -> (i32, i32) {
    %c0_i32 = arith.constant 0 : i32
    %c0_i32_0 = arith.constant 0 : i32
    return %arg0, %c0_i32 : i32, i32
  }
  func.func @transform_1(%arg0: i32) -> (i32, i32) {
    %c0_i32 = arith.constant 0 : i32
    %c0_i32_0 = arith.constant 0 : i32
    %c0_i32_1 = arith.constant 0 : i32
    return %c0_i32, %c0_i32_0 : i32, i32
  }
  func.func @transform_2(%arg0: i32) -> (i32, i32) {
    %c0_i32 = arith.constant 0 : i32
    %c0_i32_0 = arith.constant 0 : i32
    %c0_i32_1 = arith.constant 0 : i32
    return %c0_i32, %c0_i32_0 : i32, i32
  }
  func.func @transform_3(%arg0: i32) -> (i32, i32) {
    %c0_i32 = arith.constant 0 : i32
    %c0_i32_0 = arith.constant 0 : i32
    %c0_i32_1 = arith.constant 0 : i32
    return %c0_i32, %c0_i32_0 : i32, i32
  }
  func.func @transform_4(%arg0: i32) -> (i32, i32) {
    %c0_i32 = arith.constant 0 : i32
    %c0_i32_0 = arith.constant 0 : i32
    %c0_i32_1 = arith.constant 0 : i32
    return %c0_i32, %c0_i32_0 : i32, i32
  }
  func.func @transform_5(%arg0: i32) -> (i32, i32) {
    %c0_i32 = arith.constant 0 : i32
    %c0_i32_0 = arith.constant 0 : i32
    %c0_i32_1 = arith.constant 0 : i32
    return %c0_i32, %c0_i32_0 : i32, i32
  }
  func.func @transform_6(%arg0: i32) -> (i32, i32) {
    %c0_i32 = arith.constant 0 : i32
    %c0_i32_0 = arith.constant 0 : i32
    %c0_i32_1 = arith.constant 0 : i32
    return %c0_i32, %c0_i32_0 : i32, i32
  }
  func.func @transform_7(%arg0: i32) -> (i32, i32) {
    %c0_i32 = arith.constant 0 : i32
    %c0_i32_0 = arith.constant 0 : i32
    %c0_i32_1 = arith.constant 0 : i32
    return %c0_i32, %c0_i32_0 : i32, i32
  }
  func.func @transform_8(%arg0: i32) -> (i32, i32) {
    %c0_i32 = arith.constant 0 : i32
    %c0_i32_0 = arith.constant 0 : i32
    %c0_i32_1 = arith.constant 0 : i32
    return %c0_i32, %c0_i32_0 : i32, i32
  }
  func.func @transform_9(%arg0: i32) -> (i32, i32) {
    %c0_i32 = arith.constant 0 : i32
    %c0_i32_0 = arith.constant 0 : i32
    return %c0_i32, %arg0 : i32, i32
  }
}

</mosaic_0001>

<bundles_post_ra>
// kernel: co2_predictor_forward.1
= control target key start
LH: loop header
LB: loop body
LE: loop exit
PB: predicated region body
PF: predicated region fallthrough
CT: control target
= control target key end

     0   :  { %v1043_v1 = vmov 0   ;;  %vm127_vm0 = vcmask 261120   ;;  %v57_v32 = vlaneseq  ;;  %vm1045_vm1 = vmmov 0   ;;  %s1360_s1 = inlined_call_operand.vmem [shape: bf16[32,256], index: 1, kind: input, shape index: {}]   ;;  %s1361_s0 = inlined_call_operand.vmem [shape: bf16[128,32], index: 0, kind: input, shape index: {}]   ;;  %s1362_s3 = inlined_call_operand.vmem [shape: bf16[256,128], index: 3, kind: input, shape index: {}]   ;;  %s1363_s5 = inlined_call_operand.vmem [shape: bf16[128,64], index: 5, kind: input, shape index: {}]   ;;  %s1364_s2 = inlined_call_operand.vmem [shape: f32[1,256], index: 2, kind: input, shape index: {}]   ;;  %s1365_s4 = inlined_call_operand.vmem [shape: f32[1,128], index: 4, kind: input, shape index: {}]   ;;  %s1366_s8 = inlined_call_operand.<no memory space> [shape: f32[1,1], index: 8, kind: input, shape index: {}]   ;;  %s1367_s6 = inlined_call_operand.vmem [shape: f32[1,64], index: 6, kind: input, shape index: {}]   ;;  %s1368_s7 = inlined_call_operand.vmem [shape: bf16[1,64], index: 7, kind: input, shape index: {}]   ;;  %s1369_s9 = inlined_call_operand.vmem [shape: f32[1,128], index: 9, kind: output, shape index: {}]  }
   0x1   :  { %v1005_v0 = vld [vmem:[%s1360_s1 + $0x14] ss:$8 sps:$4 sm:$0xff]   ;;  %184 = vmatprep.mubr.bf16.mxu0 %v1043_v1  ;;  %1004 = vset.pattern.permute.xlu0 %v1043_v1  ;;  %v1007_v2 = vld [vmem:[%s1360_s1 + $0x10] ss:$8 sps:$4 sm:$0xff]   ;;  %v1008_v3 = vld [vmem:[%s1360_s1 + $0x4] ss:$8 sps:$4 sm:$0xff]  }
   0x2   :  { %164 = vmatprep.subr.bf16.mxu0 %v1005_v0  ;;  %v1010_v4 = vld [vmem:[%s1360_s1] ss:$8 sps:$4 sm:$0xff]   ;;  %v1019_v6 = vld [vmem:[%s1362_s3 + $0x78] sm:$0xff]   ;;  %v1021_v9 = vld [vmem:[%s1362_s3 + $0x70] sm:$0xff]   ;;  %v1206_v33 = vshrl.u32 %v57_v32, 7  ;;  %vm740_vm2 = vcmask 523264  }
   0x3   :  { %165 = vmatpush1.bf16.msra.mxu0 %v1007_v2  ;;  %v1011_v5 = vld [vmem:[%s1361_s0] sm:$0xff]   ;;  %v1012_v7 = vld [vmem:[%s1361_s0 + $0x8] sm:$0xff]   ;;  %v1020_v8 = vld [vmem:[%s1362_s3 + $0x38] sm:$0xff]   ;;  %860 = vmatprep.subr.bf16.mxu1 %v1019_v6 }
   0x4   :  { %166 = vmatprep.subr.bf16.mxu0 %v1008_v3  ;;  %861 = vmatpush3.bf16.msra.mxu1 %v1020_v8  ;;  %v1022_v10 = vld [vmem:[%s1362_s3 + $0x30] sm:$0xff]   ;;  %v1023_v11 = vld [vmem:[%s1362_s3 + $0x68] sm:$0xff]   ;;  %v1025_v13 = vld [vmem:[%s1362_s3 + $0x60] sm:$0xff]   ;;  %v59_v34 = vsub.s32 0, %v1206_v33  ;;  %v63_v36 = vsub.s32 1, %v1206_v33 }
   0x5   :  { %862 = vmatprep.subr.bf16.mxu1 %v1021_v9  ;;  %v1024_v12 = vld [vmem:[%s1362_s3 + $0x28] sm:$0xff]   ;;  %v1013_v14 = vld [vmem:[%s1361_s0 + $0x10] sm:$0xff]   ;;  %v1026_v15 = vld [vmem:[%s1362_s3 + $0x20] sm:$0xff]  }
   0x6   :  { %v1027_v16 = vld [vmem:[%s1362_s3 + $0x58] sm:$0xff]   ;;  %v1015_v19 = vld [vmem:[%s1361_s0 + $0x20] sm:$0xff]   ;;  %v1016_v20 = vld [vmem:[%s1361_s0 + $0x28] sm:$0xff]  }
   0x7   :  { %167 = vmatpush1.bf16.msra.mxu0 %v1010_v4  ;;  %v1028_v17 = vld [vmem:[%s1362_s3 + $0x18] sm:$0xff]   ;;  %v1017_v21 = vld [vmem:[%s1361_s0 + $0x30] sm:$0xff]   ;;  %v1031_v25 = vld [vmem:[%s1362_s3 + $0x48] sm:$0xff]  }
   0x8   :  { %863 = vmatpush3.bf16.msra.mxu1 %v1022_v10  ;;  %v1014_v18 = vld [vmem:[%s1361_s0 + $0x18] sm:$0xff]   ;;  %v1029_v23 = vld [vmem:[%s1362_s3 + $0x50] sm:$0xff]   ;;  %v1032_v26 = vld [vmem:[%s1362_s3 + $0x8] sm:$0xff]  }
   0x9   :  { %864 = vmatprep.subr.bf16.mxu1 %v1023_v11  ;;  %v1018_v22 = vld [vmem:[%s1361_s0 + $0x38] sm:$0xff]   ;;  %v1030_v24 = vld [vmem:[%s1362_s3 + $0x10] sm:$0xff]   ;;  %v1033_v27 = vld [vmem:[%s1362_s3 + $0x40] sm:$0xff]  }
   0xa   :  { %825 = vmatmul.mubr.msk.bf16.vlgmr.msra.gmra.mxu0 %vm127_vm0, %v1011_v5  ;;  %v1034_v28 = vld [vmem:[%s1362_s3] sm:$0xff]   ;;  %v1035_v29 = vld [vmem:[%s1363_s5 + $0x38] sm:$0xff]   ;;  %v1036_v30 = vld [vmem:[%s1363_s5 + $0x30] sm:$0xff]  }
   0xb   :  { %194 = vmatprep.mubr.bf16.mxu0 %v1043_v1  ;;  %949 = vmatprep.subr.bf16.mxu0 %v1035_v29  ;;  %v1037_v31 = vld [vmem:[%s1363_s5 + $0x28] sm:$0xff]   ;;  %v55_v35 = vld [vmem:[%s1364_s2] sm:$0x3] }
   0xc   :  { %865 = vmatpush3.bf16.msra.mxu1 %v1024_v12  ;;  %950 = vmatpush3.bf16.msra.mxu0 %v1035_v29  ;;  %v1215_v38 = vrot.slane %v55_v35, %v59_v34  ;;  %v1217_v40 = vrot.slane %v55_v35, %v63_v36 }
   0xd   :  { %866 = vmatprep.subr.bf16.mxu1 %v1025_v13  ;;  %951 = vmatprep.subr.bf16.mxu0 %v1036_v30 }
  0x10   :  { %867 = vmatpush3.bf16.msra.mxu1 %v1026_v15  ;;  %952 = vmatpush3.bf16.msra.mxu0 %v1036_v30 }
  0x11   :  { %868 = vmatprep.subr.bf16.mxu1 %v1027_v16  ;;  %953 = vmatprep.subr.bf16.mxu0 %v1037_v31 }
  0x12   :  { %826 = vmatmul.mubr.msk.bf16.gmra.mxu0 %vm127_vm0, %v1012_v7 }
  0x13   :  { %204 = vmatprep.mubr.bf16.mxu0 %v1043_v1 }
  0x14   :  { %869 = vmatpush3.bf16.msra.mxu1 %v1028_v17  ;;  %954 = vmatpush3.bf16.msra.mxu0 %v1037_v31 }
  0x15   :  { %870 = vmatprep.subr.bf16.mxu1 %v1029_v23 }
  0x18   :  { %871 = vmatpush3.bf16.msra.mxu1 %v1030_v24 }
  0x19   :  { %872 = vmatprep.subr.bf16.mxu1 %v1031_v25 }
  0x1a   :  { %827 = vmatmul.mubr.msk.bf16.gmra.mxu0 %vm127_vm0, %v1013_v14 }
  0x1b   :  { %214 = vmatprep.mubr.bf16.mxu0 %v1043_v1 }
  0x1c   :  { %873 = vmatpush3.bf16.msra.mxu1 %v1032_v26 }
  0x1d   :  { %874 = vmatprep.subr.bf16.mxu1 %v1033_v27 }
  0x20   :  { %875 = vmatpush3.bf16.msra.mxu1 %v1034_v28 }
  0x22   :  { %828 = vmatmul.mubr.msk.bf16.gmra.mxu0 %vm127_vm0, %v1014_v18 }
  0x23   :  { %224 = vmatprep.mubr.bf16.mxu0 %v1043_v1 }
  0x2a   :  { %829 = vmatmul.mubr.msk.bf16.gmra.mxu0 %vm127_vm0, %v1015_v19 }
  0x2b   :  { %234 = vmatprep.mubr.bf16.mxu0 %v1043_v1 }
  0x32   :  { %830 = vmatmul.mubr.msk.bf16.gmra.mxu0 %vm127_vm0, %v1016_v20 }
  0x33   :  { %244 = vmatprep.mubr.bf16.mxu0 %v1043_v1 }
  0x3a   :  { %831 = vmatmul.mubr.msk.bf16.gmra.mxu0 %vm127_vm0, %v1017_v21 }
  0x3b   :  { %254 = vmatprep.mubr.bf16.mxu0 %v1043_v1 }
  0x42   :  { %832 = vmatmul.mubr.msk.bf16.gmra.mxu0 %vm127_vm0, %v1018_v22 }
  0xca   :  { %v186_v37 = vpop.f32.mrf.mxu0 }
  0xcb   :  { %v187_v43 = vadd.f32 %v186_v37, %v1215_v38 }
  0xcc   :  { %v188_v39 = vpop.f32.mrf.mxu0 }
  0xcd   :  { %v189_v45 = vadd.f32 %v188_v39, %v1217_v40 }
  0xce   :  { %v190_v41 = vpop.f32.mrf.mxu0 }
  0xcf   :  { %v191_v42 = vadd.f32 %v190_v41, %v1215_v38 }
  0xd0   :  { %v192_v44 = vpop.f32.mrf.mxu0 }
  0xd1   :  { %v193_v46 = vadd.f32 %v192_v44, %v1217_v40  ;;  %v265_v47 = vpack.c.bf16 %v191_v42, %v187_v43 }
  0xd2   :  { %v196_v48 = vpop.f32.mrf.mxu0 }
  0xd3   :  { %v266_v49 = vpack.c.bf16 %v193_v46, %v189_v45  ;;  %v281_v53 = vmax.bf16 %v1043_v1, %v265_v47  ;;  %v197_v55 = vadd.f32 %v196_v48, %v1215_v38 }
  0xd4   :  { %v198_v50 = vpop.f32.mrf.mxu0 }
  0xd5   :  { %v282_v51 = vmax.bf16 %v1043_v1, %v266_v49  ;;  %v199_v57 = vadd.f32 %v198_v50, %v1217_v40 }
  0xd6   :  { %v200_v52 = vpop.f32.mrf.mxu0 }
  0xd7   :  { %v201_v54 = vadd.f32 %v200_v52, %v1215_v38  ;;  %464 = vmatprep.mubr.bf16.mxu1 %v282_v51 }
  0xd8   :  { %v202_v56 = vpop.f32.mrf.mxu0  ;;  %465 = vmatmul.mubr.bf16.vlgmr.msra.gmra.mxu1 %v281_v53 }
  0xd9   :  { %v203_v58 = vadd.f32 %v202_v56, %v1217_v40  ;;  %v267_v59 = vpack.c.bf16 %v201_v54, %v197_v55 }
  0xda   :  { %v206_v60 = vpop.f32.mrf.mxu0 }
  0xdb   :  { %v268_v61 = vpack.c.bf16 %v203_v58, %v199_v57  ;;  %v283_v2 = vmax.bf16 %v1043_v1, %v267_v59  ;;  %v207_v4 = vadd.f32 %v206_v60, %v1215_v38 }
  0xdc   :  { %v208_v62 = vpop.f32.mrf.mxu0 }
  0xdd   :  { %v284_v63 = vmax.bf16 %v1043_v1, %v268_v61  ;;  %v209_v6 = vadd.f32 %v208_v62, %v1217_v40 }
  0xde   :  { %v210_v0 = vpop.f32.mrf.mxu0 }
  0xdf   :  { %v211_v3 = vadd.f32 %v210_v0, %v1215_v38  ;;  %472 = vmatprep.mubr.bf16.mxu1 %v284_v63 }
  0xe0   :  { %v212_v5 = vpop.f32.mrf.mxu0  ;;  %473 = vmatmul.mubr.bf16.gmra.mxu1 %v283_v2 }
  0xe1   :  { %v213_v7 = vadd.f32 %v212_v5, %v1217_v40  ;;  %v269_v8 = vpack.c.bf16 %v211_v3, %v207_v4 }
  0xe2   :  { %v216_v9 = vpop.f32.mrf.mxu0 }
  0xe3   :  { %v270_v10 = vpack.c.bf16 %v213_v7, %v209_v6  ;;  %v285_v14 = vmax.bf16 %v1043_v1, %v269_v8  ;;  %v217_v16 = vadd.f32 %v216_v9, %v1215_v38 }
  0xe4   :  { %v218_v11 = vpop.f32.mrf.mxu0 }
  0xe5   :  { %v286_v12 = vmax.bf16 %v1043_v1, %v270_v10  ;;  %v219_v18 = vadd.f32 %v218_v11, %v1217_v40 }
  0xe6   :  { %v220_v13 = vpop.f32.mrf.mxu0 }
  0xe7   :  { %v221_v15 = vadd.f32 %v220_v13, %v1215_v38  ;;  %480 = vmatprep.mubr.bf16.mxu1 %v286_v12  ;;  %v1038_v13 = vld [vmem:[%s1363_s5 + $0x20] sm:$0xff]  }
  0xe8   :  { %v222_v17 = vpop.f32.mrf.mxu0  ;;  %481 = vmatmul.mubr.bf16.gmra.mxu1 %v285_v14  ;;  %955 = vmatprep.subr.bf16.mxu0 %v1038_v13  ;;  %v1041_v14 = vld [vmem:[%s1363_s5 + $0x8] sm:$0xff]  }
  0xe9   :  { %v223_v19 = vadd.f32 %v222_v17, %v1217_v40  ;;  %v271_v20 = vpack.c.bf16 %v221_v15, %v217_v16  ;;  %956 = vmatpush3.bf16.msra.mxu0 %v1038_v13  ;;  %v1042_v15 = vld [vmem:[%s1363_s5] sm:$0xff]  }
  0xea   :  { %v226_v21 = vpop.f32.mrf.mxu0 }
  0xeb   :  { %v272_v22 = vpack.c.bf16 %v223_v19, %v219_v18  ;;  %v287_v26 = vmax.bf16 %v1043_v1, %v271_v20  ;;  %v227_v28 = vadd.f32 %v226_v21, %v1215_v38  ;;  %v1285_v20 = vld [vmem:[%s1365_s4] ss:$0 sm:$0xff] }
  0xec   :  { %v228_v23 = vpop.f32.mrf.mxu0 }
  0xed   :  { %v288_v24 = vmax.bf16 %v1043_v1, %v272_v22  ;;  %v229_v30 = vadd.f32 %v228_v23, %v1217_v40 }
  0xee   :  { %v230_v25 = vpop.f32.mrf.mxu0 }
  0xef   :  { %v231_v27 = vadd.f32 %v230_v25, %v1215_v38  ;;  %488 = vmatprep.mubr.bf16.mxu1 %v288_v24 }
  0xf0   :  { %v232_v29 = vpop.f32.mrf.mxu0  ;;  %489 = vmatmul.mubr.bf16.gmra.mxu1 %v287_v26 }
  0xf1   :  { %v233_v31 = vadd.f32 %v232_v29, %v1217_v40  ;;  %v273_v32 = vpack.c.bf16 %v231_v27, %v227_v28 }
  0xf2   :  { %v236_v35 = vpop.f32.mrf.mxu0 }
  0xf3   :  { %v274_v36 = vpack.c.bf16 %v233_v31, %v229_v30  ;;  %v289_v42 = vmax.bf16 %v1043_v1, %v273_v32  ;;  %v237_v44 = vadd.f32 %v236_v35, %v1215_v38 }
  0xf4   :  { %v238_v37 = vpop.f32.mrf.mxu0 }
  0xf5   :  { %v290_v39 = vmax.bf16 %v1043_v1, %v274_v36  ;;  %v239_v46 = vadd.f32 %v238_v37, %v1217_v40 }
  0xf6   :  { %v240_v41 = vpop.f32.mrf.mxu0 }
  0xf7   :  { %v241_v43 = vadd.f32 %v240_v41, %v1215_v38  ;;  %496 = vmatprep.mubr.bf16.mxu1 %v290_v39 }
  0xf8   :  { %v242_v45 = vpop.f32.mrf.mxu0  ;;  %497 = vmatmul.mubr.bf16.gmra.mxu1 %v289_v42 }
  0xf9   :  { %v243_v47 = vadd.f32 %v242_v45, %v1217_v40  ;;  %v275_v48 = vpack.c.bf16 %v241_v43, %v237_v44 }
  0xfa   :  { %v246_v49 = vpop.f32.mrf.mxu0 }
  0xfb   :  { %v276_v50 = vpack.c.bf16 %v243_v47, %v239_v46  ;;  %v291_v54 = vmax.bf16 %v1043_v1, %v275_v48  ;;  %v247_v56 = vadd.f32 %v246_v49, %v1215_v38 }
  0xfc   :  { %v248_v51 = vpop.f32.mrf.mxu0 }
  0xfd   :  { %v292_v52 = vmax.bf16 %v1043_v1, %v276_v50  ;;  %v249_v58 = vadd.f32 %v248_v51, %v1217_v40 }
  0xfe   :  { %v250_v53 = vpop.f32.mrf.mxu0 }
  0xff   :  { %v251_v55 = vadd.f32 %v250_v53, %v1215_v38  ;;  %504 = vmatprep.mubr.bf16.mxu1 %v292_v52 }
 0x100   :  { %v252_v57 = vpop.f32.mrf.mxu0  ;;  %505 = vmatmul.mubr.bf16.gmra.mxu1 %v291_v54 }
 0x101   :  { %v253_v59 = vadd.f32 %v252_v57, %v1217_v40  ;;  %v277_v60 = vpack.c.bf16 %v251_v55, %v247_v56 }
 0x102   :  { %v256_v61 = vpop.f32.mrf.mxu0 }
 0x103   :  { %v278_v62 = vpack.c.bf16 %v253_v59, %v249_v58  ;;  %v293_v3 = vmax.bf16 %v1043_v1, %v277_v60  ;;  %v257_v5 = vadd.f32 %v256_v61, %v1215_v38 }
 0x104   :  { %v258_v63 = vpop.f32.mrf.mxu0 }
 0x105   :  { %v294_v0 = vmax.bf16 %v1043_v1, %v278_v62  ;;  %v259_v7 = vadd.f32 %v258_v63, %v1217_v40 }
 0x106   :  { %v260_v2 = vpop.f32.mrf.mxu0 }
 0x107   :  { %v261_v4 = vadd.f32 %v260_v2, %v1215_v38  ;;  %512 = vmatprep.mubr.bf16.mxu1 %v294_v0  ;;  %v1039_v38 = vld [vmem:[%s1363_s5 + $0x18] sm:$0xff]  }
 0x108   :  { %v262_v6 = vpop.f32.mrf.mxu0  ;;  %513 = vmatmul.mubr.bf16.gmra.mxu1 %v293_v3  ;;  %957 = vmatprep.subr.bf16.mxu0 %v1039_v38 }
 0x109   :  { %v263_v8 = vadd.f32 %v262_v6, %v1217_v40  ;;  %v279_v9 = vpack.c.bf16 %v261_v4, %v257_v5  ;;  %958 = vmatpush3.bf16.msra.mxu0 %v1039_v38  ;;  %v1040_v40 = vld [vmem:[%s1363_s5 + $0x10] sm:$0xff]  }
 0x10a   :  { %959 = vmatprep.subr.bf16.mxu0 %v1040_v40 }
 0x10b   :  { %v280_v10 = vpack.c.bf16 %v263_v8, %v259_v7  ;;  %v295_v12 = vmax.bf16 %v1043_v1, %v279_v9 }
 0x10d   :  { %v296_v11 = vmax.bf16 %v1043_v1, %v280_v10  ;;  %960 = vmatpush3.bf16.msra.mxu0 %v1040_v40 }
 0x10e   :  { %961 = vmatprep.subr.bf16.mxu0 %v1041_v14 }
 0x10f   :  { %520 = vmatprep.mubr.bf16.mxu1 %v296_v11 }
 0x110   :  { %521 = vmatmul.mubr.bf16.gmra.mxu1 %v295_v12 }
 0x111   :  { %962 = vmatpush3.bf16.msra.mxu0 %v1041_v14 }
 0x112   :  { %963 = vmatprep.subr.bf16.mxu0 %v1042_v15 }
 0x115   :  { %964 = vmatpush3.bf16.msra.mxu0 %v1042_v15 }
 0x198   :  { %v876_v16 = vpop.f32.mrf.mxu1 }
 0x19a   :  { %v877_v17 = vpop.f32.mrf.mxu1 }
 0x19b   :  { %v878_v19 = vadd.f32 %v877_v17, %v876_v16 }
 0x19c   :  { %v879_v18 = vpop.f32.mrf.mxu1 }
 0x19d   :  { %v467_v24 = vadd.f32 %v878_v19, %v1285_v20 }
 0x19e   :  { %v880_v21 = vpop.f32.mrf.mxu1 }
 0x19f   :  { %v881_v22 = vadd.f32 %v880_v21, %v879_v18 }
 0x1a0   :  { %v882_v23 = vpop.f32.mrf.mxu1 }
 0x1a1   :  { %v470_v25 = vadd.f32 %v881_v22, %v1285_v20 }
 0x1a2   :  { %v883_v26 = vpop.f32.mrf.mxu1 }
 0x1a3   :  { %v529_v27 = vpack.c.bf16 %v470_v25, %v467_v24  ;;  %v884_v29 = vadd.f32 %v883_v26, %v882_v23 }
 0x1a4   :  { %v885_v28 = vpop.f32.mrf.mxu1 }
 0x1a5   :  { %v537_v30 = vmax.bf16 %v1043_v1, %v529_v27  ;;  %v475_v36 = vadd.f32 %v884_v29, %v1285_v20 }
 0x1a6   :  { %v886_v31 = vpop.f32.mrf.mxu1 }
 0x1a7   :  { %v887_v32 = vadd.f32 %v886_v31, %v885_v28  ;;  %965 = vmatprep.mubr.bf16.mxu0 %v537_v30 }
 0x1a8   :  { %v888_v35 = vpop.f32.mrf.mxu1 }
 0x1a9   :  { %v478_v37 = vadd.f32 %v887_v32, %v1285_v20 }
 0x1aa   :  { %v889_v39 = vpop.f32.mrf.mxu1 }
 0x1ab   :  { %v530_v41 = vpack.c.bf16 %v478_v37, %v475_v36  ;;  %v890_v44 = vadd.f32 %v889_v39, %v888_v35 }
 0x1ac   :  { %v891_v42 = vpop.f32.mrf.mxu1 }
 0x1ad   :  { %v538_v43 = vmax.bf16 %v1043_v1, %v530_v41  ;;  %v483_v48 = vadd.f32 %v890_v44, %v1285_v20  ;;  %v1044_v41 = vmov 0.0  }
 0x1ae   :  { %v892_v45 = vpop.f32.mrf.mxu1  ;;  %981 = vmatprep.subr.bf16.mxu1 %v1044_v41  ;;  %997 = vmatprep.mubr.msk.bf16.mxu1 %vm1045_vm1, %v1044_v41 }
 0x1af   :  { %v893_v46 = vadd.f32 %v892_v45, %v891_v42  ;;  %966 = vmatmul.mubr.bf16.vlgmr.msra.gmra.mxu0 %v538_v43  ;;  %v14_v42 = vstv %s1366_s8 }
 0x1b0   :  { %v894_v47 = vpop.f32.mrf.mxu1  ;;  %15 = vst [vmem:[#allocation2] sm:$0x1] %v14_v42 }
 0x1b1   :  { %v486_v49 = vadd.f32 %v893_v46, %v1285_v20 }
 0x1b2   :  { %v895_v50 = vpop.f32.mrf.mxu1 }
 0x1b3   :  { %v531_v51 = vpack.c.bf16 %v486_v49, %v483_v48  ;;  %v896_v53 = vadd.f32 %v895_v50, %v894_v47 }
 0x1b4   :  { %v897_v52 = vpop.f32.mrf.mxu1 }
 0x1b5   :  { %v539_v54 = vmax.bf16 %v1043_v1, %v531_v51  ;;  %v491_v58 = vadd.f32 %v896_v53, %v1285_v20 }
 0x1b6   :  { %v898_v55 = vpop.f32.mrf.mxu1 }
 0x1b7   :  { %v899_v56 = vadd.f32 %v898_v55, %v897_v52  ;;  %969 = vmatprep.mubr.bf16.mxu0 %v539_v54  ;;  %v730_v46 = vld [vmem:[#allocation2] sm:$0x1] }
 0x1b8   :  { %v900_v57 = vpop.f32.mrf.mxu1  ;;  %733 = vperm.xlu0 %1004, %v730_v46  }
 0x1b9   :  { %v494_v59 = vadd.f32 %v899_v56, %v1285_v20 }
 0x1ba   :  { %v901_v60 = vpop.f32.mrf.mxu1 }
 0x1bb   :  { %v532_v61 = vpack.c.bf16 %v494_v59, %v491_v58  ;;  %v902_v63 = vadd.f32 %v901_v60, %v900_v57 }
 0x1bc   :  { %v903_v62 = vpop.f32.mrf.mxu1 }
 0x1bd   :  { %v540_v0 = vmax.bf16 %v1043_v1, %v532_v61  ;;  %v499_v5 = vadd.f32 %v902_v63, %v1285_v20 }
 0x1be   :  { %v904_v2 = vpop.f32.mrf.mxu1 }
 0x1bf   :  { %v905_v3 = vadd.f32 %v904_v2, %v903_v62  ;;  %970 = vmatmul.mubr.bf16.gmra.mxu0 %v540_v0 }
 0x1c0   :  { %v906_v4 = vpop.f32.mrf.mxu1 }
 0x1c1   :  { %v502_v6 = vadd.f32 %v905_v3, %v1285_v20 }
 0x1c2   :  { %v907_v7 = vpop.f32.mrf.mxu1 }
 0x1c3   :  { %v533_v8 = vpack.c.bf16 %v502_v6, %v499_v5  ;;  %v908_v10 = vadd.f32 %v907_v7, %v906_v4 }
 0x1c4   :  { %v909_v9 = vpop.f32.mrf.mxu1 }
 0x1c5   :  { %v541_v11 = vmax.bf16 %v1043_v1, %v533_v8  ;;  %v507_v40 = vadd.f32 %v908_v10, %v1285_v20 }
 0x1c6   :  { %v910_v12 = vpop.f32.mrf.mxu1 }
 0x1c7   :  { %v911_v13 = vadd.f32 %v910_v12, %v909_v9  ;;  %973 = vmatprep.mubr.bf16.mxu0 %v541_v11 }
 0x1c8   :  { %v912_v38 = vpop.f32.mrf.mxu1 }
 0x1c9   :  { %v510_v14 = vadd.f32 %v911_v13, %v1285_v20 }
 0x1ca   :  { %v913_v15 = vpop.f32.mrf.mxu1 }
 0x1cb   :  { %v534_v16 = vpack.c.bf16 %v510_v14, %v507_v40  ;;  %v914_v18 = vadd.f32 %v913_v15, %v912_v38 }
 0x1cc   :  { %v915_v17 = vpop.f32.mrf.mxu1 }
 0x1cd   :  { %v542_v19 = vmax.bf16 %v1043_v1, %v534_v16  ;;  %v515_v24 = vadd.f32 %v914_v18, %v1285_v20 }
 0x1ce   :  { %v916_v21 = vpop.f32.mrf.mxu1 }
 0x1cf   :  { %v917_v22 = vadd.f32 %v916_v21, %v915_v17  ;;  %974 = vmatmul.mubr.bf16.gmra.mxu0 %v542_v19 }
 0x1d0   :  { %v918_v23 = vpop.f32.mrf.mxu1 }
 0x1d1   :  { %v518_v25 = vadd.f32 %v917_v22, %v1285_v20 }
 0x1d2   :  { %v919_v26 = vpop.f32.mrf.mxu1 }
 0x1d3   :  { %v535_v27 = vpack.c.bf16 %v518_v25, %v515_v24  ;;  %v920_v29 = vadd.f32 %v919_v26, %v918_v23 }
 0x1d4   :  { %v921_v28 = vpop.f32.mrf.mxu1 }
 0x1d5   :  { %v543_v30 = vmax.bf16 %v1043_v1, %v535_v27  ;;  %v523_v35 = vadd.f32 %v920_v29, %v1285_v20 }
 0x1d6   :  { %v922_v31 = vpop.f32.mrf.mxu1 }
 0x1d7   :  { %v923_v32 = vadd.f32 %v922_v31, %v921_v28  ;;  %977 = vmatprep.mubr.bf16.mxu0 %v543_v30 }
 0x1d9   :  { %v526_v36 = vadd.f32 %v923_v32, %v1285_v20  ;;  %v850_v20 = vld [vmem:[%s1367_s6] ss:$0 sm:$0xff] }
 0x1db   :  { %v536_v37 = vpack.c.bf16 %v526_v36, %v523_v35 }
 0x1dd   :  { %v544_v39 = vmax.bf16 %v1043_v1, %v536_v37 }
 0x1df   :  { %978 = vmatmul.mubr.bf16.gmra.mxu0 %v544_v39  ;;  %v729_v39 = vld [vmem:[%s1368_s7] sm:$0x1] }
 0x233   :  { %v734_v42 = vpop.permute.xlu0 %733 }
 0x26f   :  { %v967_v43 = vpop.f32.mrf.mxu0 }
 0x270   :  { %v1319_v47 = vadd.f32 %v967_v43, %v850_v20  ;;  %v739_v43 = vrot.slane %v734_v42, %v59_v34 }
 0x271   :  { %v650_v44 = vpop.f32.mrf.mxu0 }
 0x272   :  { %v1323_v50 = vadd.f32 %v850_v20, %v650_v44 }
 0x273   :  { %v968_v45 = vpop.f32.mrf.mxu0 }
 0x274   :  { %v1321_v48 = vadd.f32 %v968_v45, %v850_v20 }
 0x275   :  { %v653_v49 = vpop.f32.mrf.mxu0 }
 0x276   :  { %v714_v51 = vpack.c.bf16 %v1321_v48, %v1319_v47  ;;  %v654_v52 = vadd.f32 %v850_v20, %v653_v49 }
 0x278   :  { %v713_v53 = vpack.c.bf16 %v654_v52, %v1323_v50  ;;  %v722_v32 = vmax.bf16 %v1043_v1, %v714_v51 }
 0x27a   :  { %v748_v35 = vsel %vm740_vm2, %v722_v32, 0  ;;  %v721_v36 = vmax.bf16 %v1043_v1, %v713_v53 }
 0x27c   :  { %v745_v37 = vsel %vm740_vm2, %v721_v36, 0 }
 0x27f   :  { %v971_v54 = vpop.f32.mrf.mxu0 }
 0x280   :  { %v675_v22 = vadd.f32 %v971_v54, %v850_v20 }
 0x281   :  { %v666_v55 = vpop.f32.mrf.mxu0 }
 0x282   :  { %v667_v27 = vadd.f32 %v850_v20, %v666_v55 }
 0x283   :  { %v972_v56 = vpop.f32.mrf.mxu0 }
 0x284   :  { %v678_v19 = vadd.f32 %v972_v56, %v850_v20 }
 0x285   :  { %v669_v57 = vpop.f32.mrf.mxu0 }
 0x286   :  { %v716_v23 = vpack.c.bf16 %v678_v19, %v675_v22  ;;  %v670_v26 = vadd.f32 %v850_v20, %v669_v57 }
 0x288   :  { %v724_v25 = vmax.bf16 %v1043_v1, %v716_v23  ;;  %v715_v28 = vpack.c.bf16 %v670_v26, %v667_v27 }
 0x28a   :  { %v754_v29 = vsel %vm740_vm2, %v724_v25, 0  ;;  %v723_v30 = vmax.bf16 %v1043_v1, %v715_v28 }
 0x28c   :  { %v751_v31 = vsel %vm740_vm2, %v723_v30, 0 }
 0x28f   :  { %v975_v58 = vpop.f32.mrf.mxu0 }
 0x290   :  { %v691_v13 = vadd.f32 %v975_v58, %v850_v20 }
 0x291   :  { %v682_v59 = vpop.f32.mrf.mxu0 }
 0x292   :  { %v683_v16 = vadd.f32 %v850_v20, %v682_v59 }
 0x293   :  { %v976_v60 = vpop.f32.mrf.mxu0 }
 0x294   :  { %v694_v11 = vadd.f32 %v976_v60, %v850_v20 }
 0x295   :  { %v685_v61 = vpop.f32.mrf.mxu0 }
 0x296   :  { %v718_v38 = vpack.c.bf16 %v694_v11, %v691_v13  ;;  %v686_v15 = vadd.f32 %v850_v20, %v685_v61 }
 0x298   :  { %v726_v14 = vmax.bf16 %v1043_v1, %v718_v38  ;;  %v717_v17 = vpack.c.bf16 %v686_v15, %v683_v16 }
 0x29a   :  { %v760_v18 = vsel %vm740_vm2, %v726_v14, 0  ;;  %v725_v21 = vmax.bf16 %v1043_v1, %v717_v17 }
 0x29c   :  { %v757_v24 = vsel %vm740_vm2, %v725_v21, 0 }
 0x29f   :  { %v979_v62 = vpop.f32.mrf.mxu0 }
 0x2a0   :  { %v707_v2 = vadd.f32 %v979_v62, %v850_v20 }
 0x2a1   :  { %v698_v63 = vpop.f32.mrf.mxu0 }
 0x2a2   :  { %v699_v7 = vadd.f32 %v850_v20, %v698_v63 }
 0x2a3   :  { %v980_v0 = vpop.f32.mrf.mxu0 }
 0x2a4   :  { %v710_v3 = vadd.f32 %v980_v0, %v850_v20 }
 0x2a5   :  { %v701_v4 = vpop.f32.mrf.mxu0 }
 0x2a6   :  { %v720_v5 = vpack.c.bf16 %v710_v3, %v707_v2  ;;  %v702_v6 = vadd.f32 %v850_v20, %v701_v4 }
 0x2a8   :  { %v728_v8 = vmax.bf16 %v1043_v1, %v720_v5  ;;  %v719_v9 = vpack.c.bf16 %v702_v6, %v699_v7 }
 0x2aa   :  { %v766_v10 = vsel %vm740_vm2, %v728_v8, 0  ;;  %v727_v12 = vmax.bf16 %v1043_v1, %v719_v9 }
 0x2ab   :  { %982 = vmatpush3.bf16.xpose.msra.mxu1 %v766_v10 }
 0x2ac   :  { %983 = vmatprep.subr.bf16.mxu1 %v1044_v41  ;;  %v763_v40 = vsel %vm740_vm2, %v727_v12, 0 }
 0x2b3   :  { %984 = vmatpush3.bf16.xpose.msra.mxu1 %v763_v40 }
 0x2b4   :  { %985 = vmatprep.subr.bf16.mxu1 %v1044_v41 }
 0x2bb   :  { %986 = vmatpush3.bf16.xpose.msra.mxu1 %v760_v18 }
 0x2bc   :  { %987 = vmatprep.subr.bf16.mxu1 %v1044_v41 }
 0x2c3   :  { %988 = vmatpush3.bf16.xpose.msra.mxu1 %v757_v24 }
 0x2c4   :  { %989 = vmatprep.subr.bf16.mxu1 %v1044_v41 }
 0x2cb   :  { %990 = vmatpush3.bf16.xpose.msra.mxu1 %v754_v29 }
 0x2cc   :  { %991 = vmatprep.subr.bf16.mxu1 %v1044_v41 }
 0x2d3   :  { %992 = vmatpush3.bf16.xpose.msra.mxu1 %v751_v31 }
 0x2d4   :  { %993 = vmatprep.subr.bf16.mxu1 %v1044_v41 }
 0x2db   :  { %994 = vmatpush3.bf16.xpose.msra.mxu1 %v748_v35 }
 0x2dc   :  { %995 = vmatprep.subr.bf16.mxu1 %v1044_v41 }
 0x2e3   :  { %996 = vmatpush3.bf16.xpose.msra.mxu1 %v745_v37 }
 0x2ea   :  { %998 = vmatmul.mubr.msk.bf16.vlgmr.msra.gmra.mxu1 %vm740_vm2, %v729_v39 }
 0x3aa   :  { %v802_v20 = vpop.f32.mrf.mxu1 }
 0x3ab   :  { %v803_v44 = vadd.f32 %v802_v20, %v739_v43 }
 0x3ac   :  { %v999_v45 = vpop.f32.mrf.mxu1 }
 0x3ad   :  { %808 = vst [vmem:[%s1369_s9] sm:$0x1] %v803_v44 }
 0x3ae   :  { %v805_v1 = vpop.f32.mrf.mxu1 }
 0x3b0   :  { %v1000_v41 = vpop.f32.mrf.mxu1 }

</bundles_post_ra>
